<compile_context>
chip_gen: v7x
topology: tpu7x:2x2x1
jax: 0.10.0
libtpu: 0.0.40
codegen_flags: <defaults>
</compile_context>

<pallas_src>
import numpy as np
import jax
import jax.numpy as jnp
from jax.experimental import pallas as pl
from jax.experimental.pallas import tpu as pltpu


# ------------------------------ fused kernel --------------------------------

def _dti_fused_kernel(x_ref, a_ref, wrel_ref, wloop_ref, bias_ref,
                      sel_ref, w1d_ref, w1t_ref, b1_ref, w2_ref, b2_ref,
                      out_ref, h_ref, wide_ref):
    """Entire DTI forward: L x RelGraphConv('bdd', self_loop) -> gather -> MLP.

    x_ref    : (N, H)       node features (compute dtype, e.g. bf16)
    a_ref    : (R*N, N)     adjacency in NATIVE (rel, dst, src) order:
                            a_ref[r*N + d, s] = norm-weighted edge s->d, rel r
    wrel_ref : (L, R*H, H)  BDD weights, relations stacked along rows
    wloop_ref: (L, H, H)    self-loop weights
    bias_ref : (L, 1, H)    layer bias (f32)
    sel_ref  : (2B, N)      one-hot [drug rows ; target rows] selection
    w1d/w1t  : (H, 2H)      top/bottom halves of the first MLP Linear
    b1_ref   : (1, 2H)      f32
    w2_ref   : (1, 2H)      second Linear weight as a row (f32)
    b2_ref   : (1, 1)       f32
    out_ref  : (1, B)       sigmoid DTI scores, lane-dense (f32)
    h_ref    : (N, H)       final node embeddings (f32)
    wide_ref : (N, R*H)     VMEM scratch, reused across layers
    """
    N, H = x_ref.shape
    L = wloop_ref.shape[0]
    R = wide_ref.shape[1] // H
    B = out_ref.shape[1]
    cdt = x_ref.dtype                       # MXU operand dtype (bf16 or f32)

    x = x_ref[...]                          # (N, H)    resident across layers
    a_flat = a_ref[...]                     # (R*N, N)  resident across layers

    # Static unroll over layers (L=2).  TODO(synk): switch to lax.fori_loop over
    # a traced layer index if L grows, to bound vreg/VMEM live ranges.
    x_f32 = x.astype(jnp.float32)
    for l in range(L):
        # (1) per-relation neighbour aggregation: ONE matmul, K = N,
        #     adjacency streamed in its native layout (no transpose anywhere).
        y = jnp.dot(a_flat, x, preferred_element_type=jnp.float32)   # (R*N, H)
        # (2) relation blocks -> lanes via scratch stores at static offsets
        #     (replaces the old in-kernel concatenate; scratch reused per layer)
        for r in range(R):
            wide_ref[:, r * H:(r + 1) * H] = y[r * N:(r + 1) * N, :].astype(cdt)
        # (3) relation-summed BDD transform: ONE matmul, K = R*H (= 128 lanes)
        agg = jnp.dot(wide_ref[...], wrel_ref[l],
                      preferred_element_type=jnp.float32)             # (N, H)
        loop_msg = jnp.dot(x, wloop_ref[l],
                           preferred_element_type=jnp.float32)        # self-loop
        x_f32 = agg + loop_msg + bias_ref[l]      # f32 epilogue (VPU, no bf16)
        x = x_f32.astype(cdt)                     # next layer's MXU operand

    h_ref[...] = x_f32                      # final node embeddings (f32)

    # ----- DTI head (fused: no extra pallas_call / HBM round trip) ----------
    # one gather matmul for drugs AND targets (stacked one-hot selection).
    # TODO(synk): at production N use scalar-prefetched int32 indices in SMEM
    # + pl.ds row reads instead of O(B*N*H) one-hot matmuls.
    emb = jnp.dot(sel_ref[...], x, preferred_element_type=jnp.float32)  # (2B,H)
    d_emb = emb[:B, :].astype(cdt)
    t_emb = emb[B:, :].astype(cdt)
    # cat([d, t], -1) @ W1 == d @ W1[:H] + t @ W1[H:]   (avoids lane concat)
    h1 = (jnp.dot(d_emb, w1d_ref[...], preferred_element_type=jnp.float32)
          + jnp.dot(t_emb, w1t_ref[...], preferred_element_type=jnp.float32)
          + b1_ref[...])
    h1 = jnp.maximum(h1, 0.0)               # ReLU; Dropout(p=0) is identity
    # width-1 Linear, emitted lane-dense as (1, B):  w2 @ h1^T   (f32)
    logit = jnp.dot(w2_ref[...], h1.T,
                    preferred_element_type=jnp.float32) + b2_ref[...]   # (1, B)
    out_ref[...] = 1.0 / (1.0 + jnp.exp(-logit))                        # Sigmoid


def dti_fused_call(x0, adj, w_bdd_full, w_loop, bias, drugs_index, targets_index,
                   w1, b1, w2, b2, compute_dtype=jnp.bfloat16):
    """Host-side layout plumbing + one pallas_call for the whole forward."""
    N, H = x0.shape
    L, R = w_bdd_full.shape[0], w_bdd_full.shape[1]
    B = int(len(drugs_index))
    cdt = compute_dtype

    # Adjacency stays in its native (R, N, N) order: merging leading dims is a
    # free view (NO transpose / second HBM copy of the largest operand).
    # TODO(synk): at production scale hoist this cast to a once-per-graph
    # preprocess, keep edge norms in f32 (or fold them post-matmul) for
    # high-fan-in graphs, and optionally stream as fp8 on v7x.
    a_flat = adj.reshape(R * N, N).astype(cdt)

    # BDD weights relation-stacked along rows: (L, R, H, H) -> (L, R*H, H) is a
    # free reshape of the parameter; the relation sum becomes ONE K=R*H matmul.
    w_rows = w_bdd_full.reshape(L, R * H, H).astype(cdt)
    wloop_c = w_loop.astype(cdt)
    bias_f = bias.reshape(L, 1, H).astype(jnp.float32)

    # drug + target one-hot selections stacked -> a single gather matmul
    sel = jnp.concatenate(
        [jax.nn.one_hot(jnp.asarray(drugs_index), N, dtype=cdt),
         jax.nn.one_hot(jnp.asarray(targets_index), N, dtype=cdt)], axis=0)

    w1d = w1[:H, :].astype(cdt)
    w1t = w1[H:, :].astype(cdt)
    b1_f = b1.reshape(1, 2 * H).astype(jnp.float32)
    w2_row = w2.reshape(1, 2 * H).astype(jnp.float32)
    b2_f = b2.reshape(1, 1).astype(jnp.float32)

    # Gridless single invocation: the L-layer fusion needs every node's
    # features resident, and at N=16 / H=32 everything fits trivially in VMEM.
    # TODO(synk): at production N, split dst-node tiles over a "parallel" grid
    # axis (mandatory to use both v7x TensorCores), make the R*N source/K axis
    # "arbitrary" with a pl.when-init accumulator, and pipeline the adjacency
    # stream (pl.Buffered(3)) -- tiles re-derived against v7x's 64 MiB VMEM
    # (target ~48 MiB live incl. double buffering), H padded to 128 lanes.
    vmem = pltpu.MemorySpace.VMEM
    out_row, h_final = pl.pallas_call(
        _dti_fused_kernel,
        out_shape=(jax.ShapeDtypeStruct((1, B), jnp.float32),
                   jax.ShapeDtypeStruct((N, H), jnp.float32)),
        in_specs=[pl.BlockSpec(memory_space=vmem)] * 11,
        out_specs=(pl.BlockSpec(memory_space=vmem),
                   pl.BlockSpec(memory_space=vmem)),
        scratch_shapes=[pltpu.VMEM((N, R * H), cdt)],
        compiler_params=pltpu.CompilerParams(
            vmem_limit_bytes=32 * 1024 * 1024),   # explicit VMEM budget
    )(x0.astype(cdt), a_flat, w_rows, wloop_c, bias_f,
      sel, w1d, w1t, b1_f, w2_row, b2_f)
    return out_row.reshape(B, 1), h_final


# ------------------------------ parameter glue ------------------------------

def expand_block_diag(w):
    # (R, nb, s, s) -> (R, nb*s, nb*s). Dense expansion is only sensible while
    # s < 128 (toy case); for s >= 128 keep blocks and do per-block matmuls.
    R, nb, s, _ = w.shape
    full = jnp.zeros((R, nb * s, nb * s), w.dtype)
    for b in range(nb):
        full = full.at[:, b * s:(b + 1) * s, b * s:(b + 1) * s].set(w[:, b])
    return full


def init_params(key, num_nodes_kg, h_dim, num_rels, num_bases, num_hidden_layers):
    sub = h_dim // num_bases
    keys = jax.random.split(key, 2 + 3 * num_hidden_layers + 1)
    params = {}
    params['embedding'] = jax.random.normal(keys[0], (num_nodes_kg, h_dim), jnp.float32)
    # w_relation exists in the torch module but is unused in forward()
    params['w_relation'] = jax.random.normal(keys[1], (num_rels, h_dim), jnp.float32)
    wb, wl, bs = [], [], []
    for l in range(num_hidden_layers):
        k1, k2, k3 = keys[2 + 3 * l], keys[3 + 3 * l], keys[4 + 3 * l]
        w_bdd = jax.random.normal(k1, (num_rels, num_bases, sub, sub), jnp.float32) / np.sqrt(sub)
        wb.append(expand_block_diag(w_bdd))
        wl.append(jax.random.normal(k2, (h_dim, h_dim), jnp.float32) / np.sqrt(h_dim))
        bs.append(jax.random.normal(k3, (1, h_dim), jnp.float32) * 0.1)
    params['w_bdd_full'] = jnp.stack(wb)    # (L, R, H, H)
    params['w_loop'] = jnp.stack(wl)        # (L, H, H)
    params['bias'] = jnp.stack(bs)          # (L, 1, H)
    kk = jax.random.split(keys[-1], 4)
    two_h = 2 * h_dim
    params['w1'] = jax.random.normal(kk[0], (two_h, two_h), jnp.float32) / np.sqrt(two_h)
    params['b1'] = jax.random.normal(kk[1], (1, two_h), jnp.float32) * 0.1
    params['w2'] = jax.random.normal(kk[2], (two_h, 1), jnp.float32) / np.sqrt(two_h)
    params['b2'] = jax.random.normal(kk[3], (1, 1), jnp.float32) * 0.1
    return params


# ------------------------------- DTI forward --------------------------------

def dti_forward(params, drugs_entityid, targets_entityid, adj, h_node_ids,
                compute_dtype=jnp.bfloat16):
    # forward(): python node_map loop (host-side glue, matches the torch code)
    node_map = {int(nid): i for i, nid in enumerate(np.asarray(h_node_ids))}
    drugs_index = np.array([node_map[int(i)] for i in drugs_entityid], np.int32)
    targets_index = np.array([node_map[int(i)] for i in targets_entityid], np.int32)

    # EmbeddingLayer lookup (XLA gather glue; a huge KG table would instead use
    # a scalar-prefetch row-gather kernel)
    x0 = jnp.take(params['embedding'], jnp.asarray(h_node_ids), axis=0)

    return dti_fused_call(x0, adj, params['w_bdd_full'], params['w_loop'],
                          params['bias'], drugs_index, targets_index,
                          params['w1'], params['b1'], params['w2'], params['b2'],
                          compute_dtype=compute_dtype)


def dti_forward_ref(params, drugs_entityid, targets_entityid, adj, h_node_ids,
                    compute_dtype=jnp.bfloat16):
    """Pure-JAX reference mirroring the kernel's precision policy and its
    aggregate-then-transform ordering ((A_r @ x) @ W_r == A_r @ (x @ W_r)).
    With compute_dtype=float32 this equals the PyTorch f32 forward (eval mode)
    up to matmul associativity."""
    c = lambda v: jnp.asarray(v).astype(compute_dtype).astype(jnp.float32)
    node_map = {int(nid): i for i, nid in enumerate(np.asarray(h_node_ids))}
    drugs_index = np.array([node_map[int(i)] for i in drugs_entityid], np.int32)
    targets_index = np.array([node_map[int(i)] for i in targets_entityid], np.int32)

    x0 = jnp.take(params['embedding'], jnp.asarray(h_node_ids), axis=0)
    L, R = params['w_bdd_full'].shape[:2]
    N, H = x0.shape
    w_rows = params['w_bdd_full'].reshape(L, R * H, H)
    a_flat = c(adj.reshape(R * N, N))

    x = c(x0)
    x_f32 = x
    for l in range(L):
        y = a_flat @ x                                            # (R*N, H) f32
        y_wide = jnp.concatenate([c(y[r * N:(r + 1) * N, :]) for r in range(R)],
                                 axis=1)                          # (N, R*H)
        agg = y_wide @ c(w_rows[l])
        x_f32 = agg + x @ c(params['w_loop'][l]) + params['bias'][l].reshape(1, H)
        x = c(x_f32)
    h = x_f32

    d = c(x[drugs_index, :])
    t = c(x[targets_index, :])
    h1 = jnp.maximum(d @ c(params['w1'][:H, :]) + t @ c(params['w1'][H:, :])
                     + params['b1'].reshape(1, -1), 0.0)
    logit = h1 @ params['w2'].reshape(-1, 1) + params['b2'].reshape(1, 1)
    out = 1.0 / (1.0 + jnp.exp(-logit))
    return out, h


if __name__ == "__main__":
    NUM_KG_NODES = 64        # num_nodes (KG entities)
    H_DIM = 32               # h_dim
    NUM_RELS = 4
    NUM_BASES = 4
    NUM_HIDDEN_LAYERS = 2
    N = 16                   # nodes in the sampled sub-graph (len(h))
    E = 40                   # edges
    B = 8                    # drug-target pairs

    key = jax.random.PRNGKey(0)
    kp, kg, ke, kd, kt, kn = jax.random.split(key, 6)
    params = init_params(kp, NUM_KG_NODES, H_DIM, NUM_RELS, NUM_BASES, NUM_HIDDEN_LAYERS)

    # graph inputs: node KG-ids h, edges (src, dst, rel type r), edge norm
    h_node_ids = np.asarray(jax.random.permutation(kg, NUM_KG_NODES)[:N])
    src = np.asarray(jax.random.randint(ke, (E,), 0, N))
    dst = np.asarray(jax.random.randint(kd, (E,), 0, N))
    etype = np.asarray(jax.random.randint(kt, (E,), 0, NUM_RELS))
    norm = np.asarray(jax.random.uniform(kn, (E,), jnp.float32, 0.1, 1.0))

    # densify DGL's sparse scatter-add aggregation into per-relation adjacency
    # (mathematically identical to per-edge bmm + scatter-sum + norm)
    adj = jnp.zeros((NUM_RELS, N, N), jnp.float32).at[etype, dst, src].add(norm)

    # drug / target KG entity ids (must appear in h, as the torch forward assumes)
    drugs_entityid = [int(h_node_ids[i]) for i in range(B)]
    targets_entityid = [int(h_node_ids[N - 1 - i]) for i in range(B)]

    out, h_final = dti_forward(params, drugs_entityid, targets_entityid, adj, h_node_ids)
    jax.block_until_ready((out, h_final))

    out_ref, h_ref = dti_forward_ref(params, drugs_entityid, targets_entityid, adj, h_node_ids)
    np.testing.assert_allclose(np.asarray(out), np.asarray(out_ref), rtol=1e-2, atol=1e-2)
    np.testing.assert_allclose(np.asarray(h_final), np.asarray(h_ref), rtol=1e-2, atol=1e-2)

    print("KERNEL_OK")
</pallas_src>

<mosaic_0001>
module attributes {stable_mosaic.version = 11 : i64} {
  func.func @_dti_fused_kernel(%arg0: memref<16x32xbf16, #tpu.memory_space<vmem>>, %arg1: memref<64x16xbf16, #tpu.memory_space<vmem>>, %arg2: memref<2x128x32xbf16, #tpu.memory_space<vmem>>, %arg3: memref<2x32x32xbf16, #tpu.memory_space<vmem>>, %arg4: memref<2x1x32xf32, #tpu.memory_space<vmem>>, %arg5: memref<16x16xbf16, #tpu.memory_space<vmem>>, %arg6: memref<32x64xbf16, #tpu.memory_space<vmem>>, %arg7: memref<32x64xbf16, #tpu.memory_space<vmem>>, %arg8: memref<1x64xf32, #tpu.memory_space<vmem>>, %arg9: memref<1x64xf32, #tpu.memory_space<vmem>>, %arg10: memref<1x1xf32, #tpu.memory_space<vmem>>, %arg11: memref<1x8xf32, #tpu.memory_space<vmem>>, %arg12: memref<16x32xf32, #tpu.memory_space<vmem>>, %arg13: memref<16x128xbf16, #tpu.memory_space<vmem>>) attributes {dimension_semantics = [], scalar_prefetch = 0 : i64, scratch_operands = 1 : i64, tpu.core_type = #tpu.core_type<tc>} {
    %c0 = arith.constant 0 : index
    %c0_0 = arith.constant 0 : index
    %0 = vector.load %arg0[%c0, %c0_0] : memref<16x32xbf16, #tpu.memory_space<vmem>>, vector<16x32xbf16>
    %c0_1 = arith.constant 0 : index
    %c0_2 = arith.constant 0 : index
    %1 = vector.load %arg1[%c0_1, %c0_2] : memref<64x16xbf16, #tpu.memory_space<vmem>>, vector<64x16xbf16>
    %cst = arith.constant dense<0.000000e+00> : vector<64x32xf32>
    %2 = tpu.matmul %1, %0, %cst {dimension_numbers = #tpu.dot_dimension_numbers<[1], [0], [0], [1], [0, 0, 1, 1], [], []>} : vector<64x16xbf16>, vector<16x32xbf16>, vector<64x32xf32> -> vector<64x32xf32>
    %3 = vector.extract_strided_slice %2 {offsets = [0, 0], sizes = [16, 32], strides = [1, 1]} : vector<64x32xf32> to vector<16x32xf32>
    %4 = arith.truncf %3 : vector<16x32xf32> to vector<16x32xbf16>
    %c0_3 = arith.constant 0 : index
    %c0_4 = arith.constant 0 : index
    %5 = vector.load %arg13[%c0_3, %c0_4] : memref<16x128xbf16, #tpu.memory_space<vmem>>, vector<16x32xbf16>
    tpu.vector_store %arg13[%c0_3, %c0_4], %4 {strides = array<i32>} : memref<16x128xbf16, #tpu.memory_space<vmem>>, vector<16x32xbf16>,
    %6 = vector.extract_strided_slice %2 {offsets = [16, 0], sizes = [16, 32], strides = [1, 1]} : vector<64x32xf32> to vector<16x32xf32>
    %7 = arith.truncf %6 : vector<16x32xf32> to vector<16x32xbf16>
    %c0_5 = arith.constant 0 : index
    %c32 = arith.constant 32 : index
    %8 = vector.load %arg13[%c0_5, %c32] : memref<16x128xbf16, #tpu.memory_space<vmem>>, vector<16x32xbf16>
    tpu.vector_store %arg13[%c0_5, %c32], %7 {strides = array<i32>} : memref<16x128xbf16, #tpu.memory_space<vmem>>, vector<16x32xbf16>,
    %9 = vector.extract_strided_slice %2 {offsets = [32, 0], sizes = [16, 32], strides = [1, 1]} : vector<64x32xf32> to vector<16x32xf32>
    %10 = arith.truncf %9 : vector<16x32xf32> to vector<16x32xbf16>
    %c0_6 = arith.constant 0 : index
    %c64 = arith.constant 64 : index
    %11 = vector.load %arg13[%c0_6, %c64] : memref<16x128xbf16, #tpu.memory_space<vmem>>, vector<16x32xbf16>
    tpu.vector_store %arg13[%c0_6, %c64], %10 {strides = array<i32>} : memref<16x128xbf16, #tpu.memory_space<vmem>>, vector<16x32xbf16>,
    %12 = vector.extract_strided_slice %2 {offsets = [48, 0], sizes = [16, 32], strides = [1, 1]} : vector<64x32xf32> to vector<16x32xf32>
    %13 = arith.truncf %12 : vector<16x32xf32> to vector<16x32xbf16>
    %c0_7 = arith.constant 0 : index
    %c96 = arith.constant 96 : index
    %14 = vector.load %arg13[%c0_7, %c96] : memref<16x128xbf16, #tpu.memory_space<vmem>>, vector<16x32xbf16>
    tpu.vector_store %arg13[%c0_7, %c96], %13 {strides = array<i32>} : memref<16x128xbf16, #tpu.memory_space<vmem>>, vector<16x32xbf16>,
    %c0_8 = arith.constant 0 : index
    %c0_9 = arith.constant 0 : index
    %15 = vector.load %arg13[%c0_8, %c0_9] : memref<16x128xbf16, #tpu.memory_space<vmem>>, vector<16x128xbf16>
    %c0_10 = arith.constant 0 : index
    %c0_11 = arith.constant 0 : index
    %c0_12 = arith.constant 0 : index
    %16 = vector.load %arg2[%c0_10, %c0_11, %c0_12] : memref<2x128x32xbf16, #tpu.memory_space<vmem>>, vector<1x128x32xbf16>
    %17 = vector.shape_cast %16 : vector<1x128x32xbf16> to vector<128x32xbf16>
    %cst_13 = arith.constant dense<0.000000e+00> : vector<16x32xf32>
    %18 = tpu.matmul %15, %17, %cst_13 {dimension_numbers = #tpu.dot_dimension_numbers<[1], [0], [0], [1], [0, 0, 1, 1], [], []>} : vector<16x128xbf16>, vector<128x32xbf16>, vector<16x32xf32> -> vector<16x32xf32>
    %c0_14 = arith.constant 0 : index
    %c0_15 = arith.constant 0 : index
    %c0_16 = arith.constant 0 : index
    %19 = vector.load %arg3[%c0_14, %c0_15, %c0_16] : memref<2x32x32xbf16, #tpu.memory_space<vmem>>, vector<1x32x32xbf16>
    %20 = vector.shape_cast %19 : vector<1x32x32xbf16> to vector<32x32xbf16>
    %cst_17 = arith.constant dense<0.000000e+00> : vector<16x32xf32>
    %21 = tpu.matmul %0, %20, %cst_17 {dimension_numbers = #tpu.dot_dimension_numbers<[1], [0], [0], [1], [0, 0, 1, 1], [], []>} : vector<16x32xbf16>, vector<32x32xbf16>, vector<16x32xf32> -> vector<16x32xf32>
    %22 = arith.addf %18, %21 : vector<16x32xf32>
    %c0_18 = arith.constant 0 : index
    %c0_19 = arith.constant 0 : index
    %c0_20 = arith.constant 0 : index
    %23 = vector.load %arg4[%c0_18, %c0_19, %c0_20] : memref<2x1x32xf32, #tpu.memory_space<vmem>>, vector<1x1x32xf32>
    %24 = vector.shape_cast %23 : vector<1x1x32xf32> to vector<1x32xf32>
    %25 = vector.broadcast %24 : vector<1x32xf32> to vector<16x32xf32>
    %26 = arith.addf %22, %25 : vector<16x32xf32>
    %27 = arith.truncf %26 : vector<16x32xf32> to vector<16x32xbf16>
    %cst_21 = arith.constant dense<0.000000e+00> : vector<64x32xf32>
    %28 = tpu.matmul %1, %27, %cst_21 {dimension_numbers = #tpu.dot_dimension_numbers<[1], [0], [0], [1], [0, 0, 1, 1], [], []>} : vector<64x16xbf16>, vector<16x32xbf16>, vector<64x32xf32> -> vector<64x32xf32>
    %29 = vector.extract_strided_slice %28 {offsets = [0, 0], sizes = [16, 32], strides = [1, 1]} : vector<64x32xf32> to vector<16x32xf32>
    %30 = arith.truncf %29 : vector<16x32xf32> to vector<16x32xbf16>
    %c0_22 = arith.constant 0 : index
    %c0_23 = arith.constant 0 : index
    %31 = vector.load %arg13[%c0_22, %c0_23] : memref<16x128xbf16, #tpu.memory_space<vmem>>, vector<16x32xbf16>
    tpu.vector_store %arg13[%c0_22, %c0_23], %30 {strides = array<i32>} : memref<16x128xbf16, #tpu.memory_space<vmem>>, vector<16x32xbf16>,
    %32 = vector.extract_strided_slice %28 {offsets = [16, 0], sizes = [16, 32], strides = [1, 1]} : vector<64x32xf32> to vector<16x32xf32>
    %33 = arith.truncf %32 : vector<16x32xf32> to vector<16x32xbf16>
    %c0_24 = arith.constant 0 : index
    %c32_25 = arith.constant 32 : index
    %34 = vector.load %arg13[%c0_24, %c32_25] : memref<16x128xbf16, #tpu.memory_space<vmem>>, vector<16x32xbf16>
    tpu.vector_store %arg13[%c0_24, %c32_25], %33 {strides = array<i32>} : memref<16x128xbf16, #tpu.memory_space<vmem>>, vector<16x32xbf16>,
    %35 = vector.extract_strided_slice %28 {offsets = [32, 0], sizes = [16, 32], strides = [1, 1]} : vector<64x32xf32> to vector<16x32xf32>
    %36 = arith.truncf %35 : vector<16x32xf32> to vector<16x32xbf16>
    %c0_26 = arith.constant 0 : index
    %c64_27 = arith.constant 64 : index
    %37 = vector.load %arg13[%c0_26, %c64_27] : memref<16x128xbf16, #tpu.memory_space<vmem>>, vector<16x32xbf16>
    tpu.vector_store %arg13[%c0_26, %c64_27], %36 {strides = array<i32>} : memref<16x128xbf16, #tpu.memory_space<vmem>>, vector<16x32xbf16>,
    %38 = vector.extract_strided_slice %28 {offsets = [48, 0], sizes = [16, 32], strides = [1, 1]} : vector<64x32xf32> to vector<16x32xf32>
    %39 = arith.truncf %38 : vector<16x32xf32> to vector<16x32xbf16>
    %c0_28 = arith.constant 0 : index
    %c96_29 = arith.constant 96 : index
    %40 = vector.load %arg13[%c0_28, %c96_29] : memref<16x128xbf16, #tpu.memory_space<vmem>>, vector<16x32xbf16>
    tpu.vector_store %arg13[%c0_28, %c96_29], %39 {strides = array<i32>} : memref<16x128xbf16, #tpu.memory_space<vmem>>, vector<16x32xbf16>,
    %c0_30 = arith.constant 0 : index
    %c0_31 = arith.constant 0 : index
    %41 = vector.load %arg13[%c0_30, %c0_31] : memref<16x128xbf16, #tpu.memory_space<vmem>>, vector<16x128xbf16>
    %c1 = arith.constant 1 : index
    %c0_32 = arith.constant 0 : index
    %c0_33 = arith.constant 0 : index
    %42 = vector.load %arg2[%c1, %c0_32, %c0_33] : memref<2x128x32xbf16, #tpu.memory_space<vmem>>, vector<1x128x32xbf16>
    %43 = vector.shape_cast %42 : vector<1x128x32xbf16> to vector<128x32xbf16>
    %cst_34 = arith.constant dense<0.000000e+00> : vector<16x32xf32>
    %44 = tpu.matmul %41, %43, %cst_34 {dimension_numbers = #tpu.dot_dimension_numbers<[1], [0], [0], [1], [0, 0, 1, 1], [], []>} : vector<16x128xbf16>, vector<128x32xbf16>, vector<16x32xf32> -> vector<16x32xf32>
    %c1_35 = arith.constant 1 : index
    %c0_36 = arith.constant 0 : index
    %c0_37 = arith.constant 0 : index
    %45 = vector.load %arg3[%c1_35, %c0_36, %c0_37] : memref<2x32x32xbf16, #tpu.memory_space<vmem>>, vector<1x32x32xbf16>
    %46 = vector.shape_cast %45 : vector<1x32x32xbf16> to vector<32x32xbf16>
    %cst_38 = arith.constant dense<0.000000e+00> : vector<16x32xf32>
    %47 = tpu.matmul %27, %46, %cst_38 {dimension_numbers = #tpu.dot_dimension_numbers<[1], [0], [0], [1], [0, 0, 1, 1], [], []>} : vector<16x32xbf16>, vector<32x32xbf16>, vector<16x32xf32> -> vector<16x32xf32>
    %48 = arith.addf %44, %47 : vector<16x32xf32>
    %c1_39 = arith.constant 1 : index
    %c0_40 = arith.constant 0 : index
    %c0_41 = arith.constant 0 : index
    %49 = vector.load %arg4[%c1_39, %c0_40, %c0_41] : memref<2x1x32xf32, #tpu.memory_space<vmem>>, vector<1x1x32xf32>
    %50 = vector.shape_cast %49 : vector<1x1x32xf32> to vector<1x32xf32>
    %51 = vector.broadcast %50 : vector<1x32xf32> to vector<16x32xf32>
    %52 = arith.addf %48, %51 : vector<16x32xf32>
    %53 = arith.truncf %52 : vector<16x32xf32> to vector<16x32xbf16>
    %c0_42 = arith.constant 0 : index
    %c0_43 = arith.constant 0 : index
    %54 = vector.load %arg12[%c0_42, %c0_43] : memref<16x32xf32, #tpu.memory_space<vmem>>, vector<16x32xf32>
    tpu.vector_store %arg12[%c0_42, %c0_43], %52 {strides = array<i32>} : memref<16x32xf32, #tpu.memory_space<vmem>>, vector<16x32xf32>,
    %c0_44 = arith.constant 0 : index
    %c0_45 = arith.constant 0 : index
    %55 = vector.load %arg5[%c0_44, %c0_45] : memref<16x16xbf16, #tpu.memory_space<vmem>>, vector<16x16xbf16>
    %cst_46 = arith.constant dense<0.000000e+00> : vector<16x32xf32>
    %56 = tpu.matmul %55, %53, %cst_46 {dimension_numbers = #tpu.dot_dimension_numbers<[1], [0], [0], [1], [0, 0, 1, 1], [], []>} : vector<16x16xbf16>, vector<16x32xbf16>, vector<16x32xf32> -> vector<16x32xf32>
    %57 = vector.extract_strided_slice %56 {offsets = [0, 0], sizes = [8, 32], strides = [1, 1]} : vector<16x32xf32> to vector<8x32xf32>
    %58 = arith.truncf %57 : vector<8x32xf32> to vector<8x32xbf16>
    %59 = vector.extract_strided_slice %56 {offsets = [8, 0], sizes = [8, 32], strides = [1, 1]} : vector<16x32xf32> to vector<8x32xf32>
    %60 = arith.truncf %59 : vector<8x32xf32> to vector<8x32xbf16>
    %c0_47 = arith.constant 0 : index
    %c0_48 = arith.constant 0 : index
    %61 = vector.load %arg6[%c0_47, %c0_48] : memref<32x64xbf16, #tpu.memory_space<vmem>>, vector<32x64xbf16>
    %cst_49 = arith.constant dense<0.000000e+00> : vector<8x64xf32>
    %62 = tpu.matmul %58, %61, %cst_49 {dimension_numbers = #tpu.dot_dimension_numbers<[1], [0], [0], [1], [0, 0, 1, 1], [], []>} : vector<8x32xbf16>, vector<32x64xbf16>, vector<8x64xf32> -> vector<8x64xf32>
    %c0_50 = arith.constant 0 : index
    %c0_51 = arith.constant 0 : index
    %63 = vector.load %arg7[%c0_50, %c0_51] : memref<32x64xbf16, #tpu.memory_space<vmem>>, vector<32x64xbf16>
    %cst_52 = arith.constant dense<0.000000e+00> : vector<8x64xf32>
    %64 = tpu.matmul %60, %63, %cst_52 {dimension_numbers = #tpu.dot_dimension_numbers<[1], [0], [0], [1], [0, 0, 1, 1], [], []>} : vector<8x32xbf16>, vector<32x64xbf16>, vector<8x64xf32> -> vector<8x64xf32>
    %65 = arith.addf %62, %64 : vector<8x64xf32>
    %c0_53 = arith.constant 0 : index
    %c0_54 = arith.constant 0 : index
    %66 = vector.load %arg8[%c0_53, %c0_54] : memref<1x64xf32, #tpu.memory_space<vmem>>, vector<1x64xf32>
    %67 = vector.broadcast %66 : vector<1x64xf32> to vector<8x64xf32>
    %68 = arith.addf %65, %67 : vector<8x64xf32>
    %cst_55 = arith.constant 0.000000e+00 : f32
    %69 = vector.broadcast %cst_55 : f32 to vector<8x64xf32>
    %70 = arith.maximumf %68, %69 : vector<8x64xf32>
    %c0_56 = arith.constant 0 : index
    %c0_57 = arith.constant 0 : index
    %71 = vector.load %arg9[%c0_56, %c0_57] : memref<1x64xf32, #tpu.memory_space<vmem>>, vector<1x64xf32>
    %72 = tpu.transpose %70, [1, 0] : vector<8x64xf32> -> vector<64x8xf32>
    %cst_58 = arith.constant dense<0.000000e+00> : vector<1x8xf32>
    %73 = tpu.matmul %71, %72, %cst_58 {dimension_numbers = #tpu.dot_dimension_numbers<[1], [0], [0], [1], [0, 0, 1, 1], [], []>} : vector<1x64xf32>, vector<64x8xf32>, vector<1x8xf32> -> vector<1x8xf32>
    %c0_59 = arith.constant 0 : index
    %c0_60 = arith.constant 0 : index
    %74 = vector.load %arg10[%c0_59, %c0_60] : memref<1x1xf32, #tpu.memory_space<vmem>>, vector<1x1xf32>
    %75 = vector.broadcast %74 : vector<1x1xf32> to vector<1x8xf32>
    %76 = arith.addf %73, %75 : vector<1x8xf32>
    %cst_61 = arith.constant 0.000000e+00 : f32
    %77 = vector.broadcast %cst_61 : f32 to vector<1x8xf32>
    %78 = arith.subf %77, %76 : vector<1x8xf32>
    %79 = math.exp %78 : vector<1x8xf32>
    %cst_62 = arith.constant 1.000000e+00 : f32
    %80 = vector.broadcast %cst_62 : f32 to vector<1x8xf32>
    %81 = arith.addf %80, %79 : vector<1x8xf32>
    %cst_63 = arith.constant 1.000000e+00 : f32
    %82 = vector.broadcast %cst_63 : f32 to vector<1x8xf32>
    %83 = arith.divf %82, %81 : vector<1x8xf32>
    %c0_64 = arith.constant 0 : index
    %c0_65 = arith.constant 0 : index
    %84 = vector.load %arg11[%c0_64, %c0_65] : memref<1x8xf32, #tpu.memory_space<vmem>>, vector<1x8xf32>
    tpu.vector_store %arg11[%c0_64, %c0_65], %83 {strides = array<i32>} : memref<1x8xf32, #tpu.memory_space<vmem>>, vector<1x8xf32>,
    return
  }
}

</mosaic_0001>

<bundles_post_ra>
// kernel: tpu_custom_call.1
= control target key start
LH: loop header
LB: loop body
LE: loop exit
PB: predicated region body
PF: predicated region fallthrough
CT: control target
= control target key end

     0   :  { %s1527_s0 = inlined_call_operand.vmem [shape: bf16[16,32], index: 0, kind: input, shape index: {}]   ;;  %s1528_s1 = inlined_call_operand.vmem [shape: bf16[64,16], index: 1, kind: input, shape index: {}]   ;;  %s1529_s2 = inlined_call_operand.vmem [shape: bf16[2,128,32], index: 2, kind: input, shape index: {}]   ;;  %s1530_s3 = inlined_call_operand.vmem [shape: bf16[2,32,32], index: 3, kind: input, shape index: {}]   ;;  %s1531_s4 = inlined_call_operand.vmem [shape: f32[2,1,32], index: 4, kind: input, shape index: {}]   ;;  %s1532_s5 = inlined_call_operand.vmem [shape: bf16[16,16], index: 5, kind: input, shape index: {}]   ;;  %s1533_s6 = inlined_call_operand.vmem [shape: bf16[32,64], index: 6, kind: input, shape index: {}]   ;;  %s1534_s7 = inlined_call_operand.vmem [shape: bf16[32,64], index: 7, kind: input, shape index: {}]   ;;  %s1535_s8 = inlined_call_operand.vmem [shape: f32[1,64], index: 8, kind: input, shape index: {}]   ;;  %s1536_s9 = inlined_call_operand.vmem [shape: f32[1,64], index: 9, kind: input, shape index: {}]   ;;  %s1537_s10 = inlined_call_operand.<no memory space> [shape: f32[1,1], index: 10, kind: input, shape index: {}]   ;;  %s1538_s11 = inlined_call_operand.hbm [shape: f32[1,8], index: 11, kind: output, shape index: {0}]   ;;  %s1539_s12 = inlined_call_operand.hbm [shape: f32[16,32], index: 12, kind: output, shape index: {1}]  }
   0x1   :  { %v18_v0 = vstv %s1537_s10 }
   0x2   :  { %19 = vst [vmem:[#allocation3] sm:$0x1] %v18_v0 }
   0x3   :  { %20 = vsyncpa [#allocation5], 0  ;;  %v1158_v1 = vld [vmem:[%s1527_s0] sm:$0xff]   ;;  %vm81_vm0 = vcmask 130048   ;;  %v1327_v3 = vld [vmem:[%s1528_s1 + $0x8] sm:$0xff]  }
   0x4   :  { %v1159_v2 = vld [vmem:[%s1528_s1] sm:$0xff]   ;;  %1044 = vmatprep.subr.bf16.mxu0 %v1158_v1  ;;  %v1333_v4 = vld [vmem:[%s1528_s1 + $0x10] sm:$0xff]   ;;  %v1342_v5 = vld [vmem:[%s1528_s1 + $0x18] sm:$0xff]  }
   0x5   :  { %1045 = vmatpush3.bf16.msra.mxu0 %v1158_v1  ;;  %1046 = vmatprep.mubr.msk.bf16.mxu0 %vm81_vm0, %v1159_v2 }
   0x8   :  { %1047 = vmatmul.mubr.msk.bf16.vlgmr.msra.gmra.mrb[0].mxu0 %vm81_vm0, %v1327_v3 }
   0x9   :  { %1050 = vmatprep.mubr.msk.bf16.mxu0 %vm81_vm0, %v1333_v4 }
  0x10   :  { %1051 = vmatmul.mubr.msk.bf16.gmra.mrb[4].mxu0 %vm81_vm0, %v1342_v5 }
  0x11   :  { %21 = vsyncpa [#allocation7], 0  ;;  %v1163_v6 = vld [vmem:[%s1529_s2] sm:$0xff]   ;;  %v1240_v7 = vmov 0.0   ;;  %v1164_v8 = vld [vmem:[%s1529_s2 + $0x8] sm:$0xff]   ;;  %vm160_vm1 = vcmask 261120  }
  0x12   :  { %1062 = vmatprep.subr.bf16.mxu0 %v1240_v7  ;;  %1054 = vmatprep.subr.bf16.mxu1 %v1240_v7  ;;  %v1165_v9 = vld [vmem:[%s1529_s2 + $0x10] sm:$0xff]   ;;  %v1166_v10 = vld [vmem:[%s1529_s2 + $0x18] sm:$0xff]   ;;  %v1167_v11 = vld [vmem:[%s1529_s2 + $0x20] sm:$0xff]   ;;  %vm1241_vm2 = vmmov 0   ;;  %s1242_s30 = smov 32   ;;  %s1243_s13 = smov 96  }
  0x13   :  { %1063 = vmatpush3.bf16.msra.mxu0 %v1163_v6  ;;  %v1168_v12 = vld [vmem:[%s1529_s2 + $0x28] sm:$0xff]   ;;  %v1169_v13 = vld [vmem:[%s1530_s3] sm:$0xff]   ;;  %v1170_v16 = vld [vmem:[%s1529_s2 + $0x30] sm:$0xff]   ;;  %1058 = vmatprep.mubr.msk.bf16.mxu1 %vm1241_vm2, %v1240_v7  ;;  %s1244_s14 = smov 64   ;;  %vm167_vm3 = vcmask 523520   ;;  %vm174_vm4 = vcmask 785920  }
  0x14   :  { %1064 = vmatprep.subr.bf16.mxu0 %v1240_v7  ;;  %1055 = vmatpush3.bf16.msra.mxu1 %v1169_v13  ;;  %v1171_v18 = vld [vmem:[%s1530_s3 + $0x8] sm:$0xff]   ;;  %v1172_v21 = vld [vmem:[%s1529_s2 + $0x38] sm:$0xff]   ;;  %vm181_vm5 = vcmask 1048320   ;;  %v951_v40 = vld [vmem:[%s1531_s4] ss:$0 sm:$0xff]  ;;  %vm816_vm6 = vcmask 523264  }
  0x15   :  { %1056 = vmatprep.subr.bf16.mxu1 %v1240_v7  ;;  %1078 = vmatprep.mubr.msk.bf16.mxu0 %vm1241_vm2, %v1240_v7  ;;  %v1173_v47 = vld [vmem:[%s1530_s3 + $0x10] sm:$0xff]   ;;  %v1174_v48 = vld [vmem:[%s1530_s3 + $0x18] sm:$0xff]   ;;  %v1175_v49 = vld [vmem:[%s1529_s2 + $0x40] sm:$0xff]   ;;  %s1246_s24 = smov [#allocation6]  }
  0x16   :  { %v1176_v50 = vld [vmem:[%s1529_s2 + $0x48] sm:$0xff]   ;;  %v1177_v51 = vld [vmem:[%s1529_s2 + $0x50] sm:$0xff]   ;;  %v1178_v52 = vld [vmem:[%s1529_s2 + $0x58] sm:$0xff]   ;;  %s916_s25 = sshll.u32 %s1246_s24, 4  ;;  %s917_s25 = int_to_ptr.vmem [resolvable:$true] %s916_s25 }
  0x17   :  { %1065 = vmatpush3.bf16.msra.mxu0 %v1164_v8  ;;  %v1179_v53 = vld [vmem:[%s1529_s2 + $0x60] sm:$0xff]   ;;  %v1180_v54 = vld [vmem:[%s1529_s2 + $0x68] sm:$0xff]   ;;  %v1181_v57 = vld [vmem:[%s1529_s2 + $0x70] sm:$0xff]   ;;  %s1192_s26 = scalar_lea.vmem %s917_s25, 256  ;;  %p1197_p1 = scmp.lt.s32.totalorder %s917_s25, %s917_s25 }
  0x18   :  { %1066 = vmatprep.subr.bf16.mxu0 %v1240_v7  ;;  %1057 = vmatpush3.bf16.msra.mxu1 %v1171_v18  ;;  %v1182_v61 = vld [vmem:[%s1529_s2 + $0x78] sm:$0xff]   ;;  %p1193_p0 = scmp.ne.s32.totalorder %s917_s25, %s1192_s26  ;;  %p1198_p2 = scmp.lt.s32.totalorder %s1192_s26, %s1192_s26 }
  0x1a   :  { %p1199_p3 = por %p1198_p2, %p1197_p1 }
  0x1b   :  { %1067 = vmatpush3.bf16.msra.mxu0 %v1165_v9  ;;  %1059 = vmatmul.mubr.msk.bf16.vlgmr.msra.gmra.mrb[0].mxu1 %vm160_vm1, %v1158_v1 }
  0x1c   :  { %1068 = vmatprep.subr.bf16.mxu0 %v1240_v7  ;;  %1084 = vmatprep.mubr.msk.bf16.mxu1 %vm81_vm0, %v1159_v2  ;;  %p1200_p4 = pnand %p1199_p3, %p1193_p0 }
  0x1f   :  { %1069 = vmatpush3.bf16.msra.mxu0 %v1166_v10 }
  0x20   :  { %1070 = vmatprep.subr.bf16.mxu0 %v1240_v7 }
  0x23   :  { %1071 = vmatpush3.bf16.msra.mxu0 %v1167_v11 }
  0x24   :  { %1072 = vmatprep.subr.bf16.mxu0 %v1240_v7 }
  0x27   :  { %1073 = vmatpush3.bf16.msra.mxu0 %v1168_v12 }
  0x28   :  { %1074 = vmatprep.subr.bf16.mxu0 %v1240_v7 }
  0x2b   :  { %1075 = vmatpush3.bf16.msra.mxu0 %v1170_v16 }
  0x2c   :  { %1076 = vmatprep.subr.bf16.mxu0 %v1240_v7 }
  0x2f   :  { %1077 = vmatpush3.bf16.msra.mxu0 %v1172_v21 }
  0x30   :  { %1120 = vmatprep.subr.bf16.mxu0 %v1240_v7 }
  0xdb   :  { %v1048_v14 = vpop.f32.mrb[0].mxu0 }
  0xdc   :  { %v128_v15 = vpop.f32.mrb[1].mxu0 }
  0xdd   :  { %v1049_v17 = vpop.f32.mrb[2].mxu0 }
  0xde   :  { %v162_v19 = vpack.c.bf16 %v1049_v17, %v1048_v14  ;;  %v131_v20 = vpop.f32.mrb[3].mxu0 }
  0xdf   :  { %v159_v22 = vpack.c.bf16 %v131_v20, %v128_v15  ;;  %v988_v15 = vld [vmem:[%s1531_s4 + $0x1] ss:$0 sm:$0xff] }
  0xe0   :  { %164 = vrot.lane.b32.xlu0 %v162_v19, %s1242_s30 }
  0xe1   :  { %161 = vst.msk [vmem:[#allocation2] sm:$0xff] %vm160_vm1, %v159_v22 }
  0xe3   :  { %v1052_v23 = vpop.f32.mrb[4].mxu0 }
  0xe4   :  { %v144_v24 = vpop.f32.mrb[5].mxu0 }
  0xe5   :  { %v1053_v25 = vpop.f32.mrb[6].mxu0 }
  0xe6   :  { %v176_v26 = vpack.c.bf16 %v1053_v25, %v1052_v23  ;;  %v147_v27 = vpop.f32.mrb[7].mxu0  ;;  %v1184_v25 = vld [vmem:[%s1534_s7] sm:$0xff]  }
  0xe7   :  { %v169_v28 = vpack.c.bf16 %v147_v27, %v144_v24  ;;  %v1183_v24 = vld [vmem:[%s1532_s5] sm:$0xff]  }
  0xe8   :  { %178 = vrot.lane.b32.xlu1 %v176_v26, %s1243_s13  ;;  %v1185_v26 = vld [vmem:[%s1534_s7 + $0x8] sm:$0xff]  }
  0xe9   :  { %171 = vrot.lane.b32.xlu0 %v169_v28, %s1244_s14 }
  0xee   :  { %v253_v33 = vpop.f32.mrb[0].mxu1 }
  0xef   :  { %v1060_v34 = vpop.f32.mrb[1].mxu1 }
  0xf0   :  { %v256_v35 = vpop.f32.mrb[2].mxu1 }
  0xf1   :  { %v1061_v36 = vpop.f32.mrb[3].mxu1 }
  0xf2   :  { %v1245_v36 = vmov 0  }
  0xf3   :  { %1157 = vset.pattern.permute.xlu0 %v1245_v36 }
 0x152   :  { %v165_v29 = vpop.permute.xlu0 %164 }
 0x153   :  { %168 = vst.msk [vmem:[#allocation2] sm:$0xff] %vm167_vm3, %v165_v29 }
 0x15a   :  { %v179_v31 = vpop.permute.xlu1 %178 }
 0x15b   :  { %v172_v30 = vpop.permute.xlu0 %171 }
 0x15c   :  { %175 = vst.msk [vmem:[#allocation2] sm:$0xff] %vm174_vm4, %v172_v30  ;;  %v1186_v30 = vld [vmem:[%s1533_s6] sm:$0xff]  }
 0x15d   :  { %182 = vst.msk [vmem:[#allocation2] sm:$0xff] %vm181_vm5, %v179_v31 }
 0x164   :  { %v183_v32 = vld [vmem:[#allocation2] sm:$0xff] }
 0x165   :  { %1079 = vmatmul.mubr.bf16.vlgmr.msra.gmra.mrb[8].mxu0 %v183_v32 }
 0x166   :  { %1122 = vmatprep.mubr.msk.bf16.mxu0 %vm1241_vm2, %v1240_v7 }
 0x238   :  { %v342_v37 = vpop.f32.mrb[8].mxu0 }
 0x239   :  { %v343_v38 = vadd.f32 %v342_v37, %v253_v33  ;;  %v1080_v39 = vpop.f32.mrb[9].mxu0  ;;  %v1187_v33 = vld [vmem:[%s1533_s6 + $0x8] sm:$0xff]  }
 0x23a   :  { %v345_v41 = vpop.f32.mrb[10].mxu0 }
 0x23b   :  { %v346_v42 = vadd.f32 %v345_v41, %v256_v35  ;;  %v1081_v43 = vpop.f32.mrb[11].mxu0  ;;  %v356_v44 = vadd.f32 %v951_v40, %v343_v38  ;;  %v806_v35 = vld [vmem:[#allocation3] sm:$0x1] }
 0x23d   :  { %v357_v45 = vadd.f32 %v951_v40, %v346_v42  ;;  %v997_v42 = vld [vmem:[%s1535_s8] ss:$0 sm:$0xff] }
 0x23f   :  { %v358_v46 = vpack.c.bf16 %v357_v45, %v356_v44 }
 0x241   :  { %1082 = vmatprep.subr.bf16.mxu1 %v358_v46 }
 0x242   :  { %1083 = vmatpush3.bf16.msra.mxu1 %v358_v46 }
 0x243   :  { %1092 = vmatprep.subr.bf16.mxu1 %v1240_v7 }
 0x245   :  { %1085 = vmatmul.mubr.msk.bf16.vlgmr.msra.gmra.mrb[4].mxu1 %vm81_vm0, %v1327_v3 }
 0x246   :  { %1088 = vmatprep.mubr.msk.bf16.mxu1 %vm81_vm0, %v1333_v4  ;;  %1093 = vmatpush3.bf16.msra.mxu1 %v1173_v47 }
 0x247   :  { %1094 = vmatprep.subr.bf16.mxu1 %v1240_v7 }
 0x24a   :  { %1095 = vmatpush3.bf16.msra.mxu1 %v1174_v48  ;;  %v805_v48 = vld [vmem:[%s1536_s9] sm:$0x1] }
 0x24b   :  { %1100 = vmatprep.subr.bf16.mxu1 %v1240_v7 }
 0x24d   :  { %1089 = vmatmul.mubr.msk.bf16.gmra.mrb[8].mxu1 %vm81_vm0, %v1342_v5 }
 0x24e   :  { %1096 = vmatprep.mubr.msk.bf16.mxu1 %vm1241_vm2, %v1240_v7 }
 0x255   :  { %1097 = vmatmul.mubr.msk.bf16.vlgmr.msra.gmra.mrb[12].mxu1 %vm160_vm1, %v358_v46 }
 0x256   :  { %1116 = vmatprep.mubr.msk.bf16.mxu1 %vm1241_vm2, %v1240_v7  ;;  %1101 = vmatpush3.bf16.msra.mxu1 %v1175_v49 }
 0x257   :  { %1102 = vmatprep.subr.bf16.mxu1 %v1240_v7 }
 0x25a   :  { %1103 = vmatpush3.bf16.msra.mxu1 %v1176_v50 }
 0x25b   :  { %1104 = vmatprep.subr.bf16.mxu1 %v1240_v7 }
 0x25e   :  { %1105 = vmatpush3.bf16.msra.mxu1 %v1177_v51 }
 0x25f   :  { %1106 = vmatprep.subr.bf16.mxu1 %v1240_v7 }
 0x262   :  { %1107 = vmatpush3.bf16.msra.mxu1 %v1178_v52 }
 0x263   :  { %1108 = vmatprep.subr.bf16.mxu1 %v1240_v7 }
 0x266   :  { %1109 = vmatpush3.bf16.msra.mxu1 %v1179_v53 }
 0x267   :  { %1110 = vmatprep.subr.bf16.mxu1 %v1240_v7 }
 0x26a   :  { %1111 = vmatpush3.bf16.msra.mxu1 %v1180_v54 }
 0x26b   :  { %1112 = vmatprep.subr.bf16.mxu1 %v1240_v7 }
 0x26e   :  { %1113 = vmatpush3.bf16.msra.mxu1 %v1181_v57 }
 0x26f   :  { %1114 = vmatprep.subr.bf16.mxu1 %v1240_v7 }
 0x272   :  { %1115 = vmatpush3.bf16.msra.mxu1 %v1182_v61 }
 0x318   :  { %v1086_v55 = vpop.f32.mrb[4].mxu1 }
 0x319   :  { %v393_v56 = vpop.f32.mrb[5].mxu1 }
 0x31a   :  { %v1087_v58 = vpop.f32.mrb[6].mxu1 }
 0x31b   :  { %v426_v59 = vpack.c.bf16 %v1087_v58, %v1086_v55  ;;  %v396_v60 = vpop.f32.mrb[7].mxu1 }
 0x31c   :  { %v424_v62 = vpack.c.bf16 %v396_v60, %v393_v56 }
 0x31d   :  { %428 = vrot.lane.b32.xlu1 %v426_v59, %s1242_s30 }
 0x31e   :  { %425 = vst.msk [vmem:[#allocation2] sm:$0xff] %vm160_vm1, %v424_v62 }
 0x320   :  { %v1090_v63 = vpop.f32.mrb[8].mxu1 }
 0x321   :  { %v409_v0 = vpop.f32.mrb[9].mxu1 }
 0x322   :  { %v1091_v1 = vpop.f32.mrb[10].mxu1 }
 0x323   :  { %v438_v2 = vpack.c.bf16 %v1091_v1, %v1090_v63  ;;  %v412_v3 = vpop.f32.mrb[11].mxu1 }
 0x324   :  { %v432_v4 = vpack.c.bf16 %v412_v3, %v409_v0 }
 0x325   :  { %440 = vrot.lane.b32.xlu1 %v438_v2, %s1243_s13 }
 0x326   :  { %434 = vrot.lane.b32.xlu0 %v432_v4, %s1244_s14 }
 0x328   :  { %v516_v5 = vpop.f32.mrb[12].mxu1 }
 0x329   :  { %v1098_v6 = vpop.f32.mrb[13].mxu1 }
 0x32a   :  { %v519_v8 = vpop.f32.mrb[14].mxu1  ;;  %809 = vperm.xlu0 %1157, %v806_v35  }
 0x32b   :  { %v1099_v9 = vpop.f32.mrb[15].mxu1 }
 0x38f   :  { %v429_v10 = vpop.permute.xlu1 %428 }
 0x390   :  { %431 = vst.msk [vmem:[#allocation2] sm:$0xff] %vm167_vm3, %v429_v10 }
 0x397   :  { %v441_v12 = vpop.permute.xlu1 %440 }
 0x398   :  { %v435_v11 = vpop.permute.xlu0 %434 }
 0x399   :  { %437 = vst.msk [vmem:[#allocation2] sm:$0xff] %vm174_vm4, %v435_v11 }
 0x39a   :  { %443 = vst.msk [vmem:[#allocation2] sm:$0xff] %vm181_vm5, %v441_v12 }
 0x3a1   :  { %v444_v13 = vld [vmem:[#allocation2] sm:$0xff] }
 0x3a2   :  { %1117 = vmatmul.mubr.bf16.vlgmr.msra.gmra.mrb[16].mxu1 %v444_v13 }
 0x475   :  { %v605_v14 = vpop.f32.mrb[16].mxu1 }
 0x476   :  { %v606_v16 = vadd.f32 %v605_v14, %v516_v5  ;;  %v1118_v17 = vpop.f32.mrb[17].mxu1 }
 0x477   :  { %v608_v18 = vpop.f32.mrb[18].mxu1 }
 0x478   :  { %v620_v19 = vadd.f32 %v988_v15, %v606_v16  ;;  %v609_v20 = vadd.f32 %v608_v18, %v519_v8  ;;  %v1119_v21 = vpop.f32.mrb[19].mxu1 }
 0x47a   :  { %623 = vst.msk [vmem:[#allocation6] sm:$0xff] %vm160_vm1, %v620_v19  ;;  %v621_v22 = vadd.f32 %v988_v15, %v609_v20 }
 0x47c   :  { %v622_v23 = vpack.c.bf16 %v621_v22, %v620_v19  ;;  %624 = vst.msk [vmem:[#allocation6 + $0x8] sm:$0xff] %vm160_vm1, %v621_v22 }
 0x47e   :  { %1121 = vmatpush3.bf16.msra.mxu0 %v622_v23 }
 0x47f   :  { %1126 = vmatprep.subr.bf16.mxu0 %v1240_v7 }
 0x481   :  { %1123 = vmatmul.mubr.msk.bf16.vlgmr.msra.gmra.mrb[12].mxu0 %vm81_vm0, %v1183_v24 }
 0x482   :  { %1127 = vmatpush3.bf16.msra.mxu0 %v1184_v25  ;;  %1130 = vmatprep.mubr.msk.bf16.mxu0 %vm1241_vm2, %v1240_v7 }
 0x483   :  { %1128 = vmatprep.subr.bf16.mxu0 %v1240_v7 }
 0x486   :  { %1129 = vmatpush3.bf16.msra.mxu0 %v1185_v26 }
 0x487   :  { %1134 = vmatprep.subr.bf16.mxu0 %v1240_v7 }
 0x554   :  { %v669_v27 = vpop.f32.mrb[12].mxu0 }
 0x555   :  { %v1124_v28 = vpop.f32.mrb[13].mxu0  ;;  %v676_v34 = vpack.c.bf16 %v669_v27, %v669_v27 }
 0x556   :  { %v672_v29 = vpop.f32.mrb[14].mxu0 }
 0x557   :  { %v677_v31 = vpack.c.bf16 %v672_v29, %v672_v29  ;;  %v1125_v32 = vpop.f32.mrb[15].mxu0 }
 0x559   :  { %1131 = vmatmul.mubr.msk.bf16.vlgmr.msra.gmra.mrb[16].mxu0 %vm160_vm1, %v677_v31 }
 0x55a   :  { %1135 = vmatpush3.bf16.msra.mxu0 %v1186_v30  ;;  %1138 = vmatprep.mubr.msk.bf16.mxu0 %vm1241_vm2, %v1240_v7 }
 0x55b   :  { %1136 = vmatprep.subr.bf16.mxu0 %v1240_v7 }
 0x55e   :  { %1137 = vmatpush3.bf16.msra.mxu0 %v1187_v33 }
 0x55f   :  { %1142 = vmatprep.subr.mxu0 %v1240_v7 }
 0x561   :  { %1139 = vmatmul.mubr.msk.bf16.vlgmr.msra.gmra.mrb[20].mxu0 %vm160_vm1, %v676_v34 }
 0x562   :  { %1144 = vmatprep.mubr.msk.f32.mxu0 %vm1241_vm2, %v1240_v7 }
 0x62c   :  { %v735_v37 = vpop.f32.mrb[16].mxu0 }
 0x62d   :  { %v1132_v38 = vpop.f32.mrb[17].mxu0 }
 0x62e   :  { %v738_v39 = vpop.f32.mrb[18].mxu0 }
 0x62f   :  { %v1133_v40 = vpop.f32.mrb[19].mxu0 }
 0x634   :  { %v790_v41 = vpop.f32.mrb[20].mxu0 }
 0x635   :  { %v791_v43 = vadd.f32 %v790_v41, %v735_v37  ;;  %v1140_v44 = vpop.f32.mrb[21].mxu0 }
 0x636   :  { %v793_v45 = vpop.f32.mrb[22].mxu0 }
 0x637   :  { %v803_v46 = vadd.f32 %v997_v42, %v791_v43  ;;  %v1141_v47 = vpop.f32.mrb[23].mxu0 }
 0x639   :  { %v804_v7 = vmax.f32 %v803_v46, 0.0 }
 0x63b   :  { %1143 = vmatpush3.xpose.msk.msra.mxu0 %vm816_vm6, %v804_v7 }
 0x63e   :  { %1145 = vmatmul.mubr.msk.f32.vlgmr.msra.gmra.mrb[24].mxu0 %vm816_vm6, %v805_v48 }
 0x63f   :  { %1203 = shalt.err (!%p1200_p4)
}
 0x640   :  { %s1204_s28 = scalar_lea.hbm %s1539_s12, 256 }
 0x641   :  { %p1205_p5 = scmp.ne.s32.totalorder %s1539_s12, %s1204_s28  ;;  %p1208_p6 = scmp.lt.u32.totalorder %s1204_s28, %s1539_s12 }
 0x643   :  { %p1210_p7 = pnand %p1208_p6, %p1205_p5 }
 0x645   :  { %1213 = shalt.err (!%p1210_p7)
}
 0x646   :  { %s1247_s15 = smov 128   ;;  %s1248_s16 = smov 8   ;;  %v812_v49 = vlaneseq  ;;  %v810_v52 = vpop.permute.xlu0 %809  ;;  %vm899_vm7 = vcmask 57344  }
 0x647   :  { %922 = dma.vmem_to_hbm [thread:$0]  %s917_s25, 256, %s1539_s12, [#allocation7], %s1247_s15, %s1247_s15, %s1248_s16  }
 0x648   :  { %v813_v50 = vshrl.u32 %v812_v49, 7  ;;  %s1249_s30 = smov [#allocation4]  }
 0x649   :  { %s907_s13 = sshll.u32 %s1249_s30, 4  ;;  %s908_s13 = int_to_ptr.vmem [resolvable:$true] %s907_s13 }
 0x64a   :  { %v814_v51 = vsub.s32 0, %v813_v50  ;;  %s1214_s12 = scalar_lea.vmem %s908_s13, 16  ;;  %s1218_s14 = scalar_lea.vmem %s908_s13, 32 }
 0x64b   :  { %p1215_p8 = scmp.ne.s32.totalorder %s908_s13, %s1214_s12  ;;  %p1219_p9 = scmp.lt.s32.totalorder %s908_s13, %s908_s13 }
 0x64c   :  { %v815_v53 = vrot.slane %v810_v52, %v814_v51  ;;  %p1220_p10 = scmp.lt.s32.totalorder %s1218_s14, %s1214_s12 }
 0x64e   :  { %p1221_p11 = por %p1220_p10, %p1219_p9 }
 0x650   :  { %p1222_p12 = pnand %p1221_p11, %p1215_p8 }
 0x711   :  { %v889_v54 = vpop.f32.mrb[24].mxu0 }
 0x712   :  { %v890_v55 = vadd.f32 %v889_v54, %v815_v53  ;;  %v1146_v56 = vpop.f32.mrb[25].mxu0 }
 0x714   :  { %v893_v57 = vsub.f32 0.0, %v890_v55 }
 0x716   :  { %v894_v58 = vmul.f32 1.442695, %v893_v57 }
 0x718   :  { %1188 = vpow2.f32 %v894_v58 }
 0x722   :  { %v1189_v59 = vpop.eup %1188 }
 0x723   :  { %v896_v60 = vadd.f32 1.0, %v1189_v59 }
 0x725   :  { %1190 = vrcp.f32 %v896_v60 }
 0x72f   :  { %v1191_v61 = vpop.eup %1190 }
 0x730   :  { %900 = vst.msk [vmem:[#allocation4] sm:$0x1] %vm899_vm7, %v1191_v61 }
 0x731   :  { %1225 = shalt.err (!%p1222_p12)
}
 0x732   :  { %s1226_s4 = scalar_lea.hbm %s1538_s11, 16 }
 0x733   :  { %p1227_p13 = scmp.ne.s32.totalorder %s1538_s11, %s1226_s4  ;;  %p1230_p0 = scmp.lt.u32.totalorder %s1226_s4, %s1538_s11 }
 0x735   :  { %p1232_p1 = pnand %p1230_p0, %p1227_p13 }
 0x737   :  { %1235 = shalt.err (!%p1232_p1)
}
 0x738   :  { %910 = dma.vmem_to_hbm [thread:$0]  %s908_s13, 16, %s1538_s11, [#allocation5]  }
 0x739   :  { %1236 = dma.done.wait [#allocation5], 16  }
 0x73a   :  { %1237 = vsyncadd [#allocation5], 4294967280 }
 0x73b   :  { %1238 = dma.done.wait [#allocation7], 256  }
 0x73c   :  { %1239 = vsyncadd [#allocation7], 4294967040 }
 0x73d   :  { %929 = vsyncpa [#allocation5], 1 }
 0x73e   :  { %930 = vsyncpa [#allocation7], 1 }

</bundles_post_ra>
